<compile_context>
chip_gen: v7x
topology: tpu7x:2x2x1
jax: 0.10.0
libtpu: 0.0.40
codegen_flags: <defaults>
</compile_context>

<pallas_src>
import math

import jax
import jax.numpy as jnp
from jax.experimental import pallas as pl
from jax.experimental.pallas import tpu as pltpu


_LANE = 128                       # vreg lane width
_MAX_TILE_ELEMS = 1 << 20         # ~4 MiB f32 per input per pipeline buffer


def custom_sequence_loss(predictions, targets,
                         start_weight=1.0, end_weight=1.0, sequence_weight=1.0,
                         max_tile_elems=_MAX_TILE_ELEMS):
    """Pallas equivalent of CustomSequenceLoss.forward (returns a scalar)."""
    assert predictions.shape == targets.shape
    B, T, D = predictions.shape
    N = B * T * D
    period = T * D                 # flat-index period of one sequence
    inv_seq = 1.0 / float(N)       # MSE denom for the full tensor
    inv_edge = 1.0 / float(B * D)  # MSE denom for one timestep slice
    itemsize = predictions.dtype.itemsize

    # ---- lane-dense flattening (free reshape of contiguous data) -----------
    if N % _LANE == 0:
        lane = _LANE
    else:
        # Fallback: [B*T, D] view.  Still correct; lanes under-utilised when
        # D % 128 != 0 but HBM traffic is unchanged (kernel stays DMA-bound).
        lane = D
    rows = N // lane

    # ---- tile selection -----------------------------------------------------
    cap_rows = max(8, max_tile_elems // lane)
    if rows <= cap_rows:
        tile_rows = rows           # whole array in one block (always legal)
        fused = True               # block base == 0 -> trivially invariant
    else:
        # Rows per weight period; a tile must be a multiple of it (and of the
        # 8-sublane granule) for the weight tile to be identical in every block.
        row_period = period // math.gcd(period, lane)
        unit = (row_period * 8) // math.gcd(row_period, 8)   # lcm(row_period, 8)
        if unit <= cap_rows:
            fused = True
        else:
            fused = False          # weight tile would exceed the VMEM budget:
            unit = 8               # constant weight + wrapper-side edge MSEs
        tile_rows = (cap_rows // unit) * unit

    tile_elems = tile_rows * lane
    nb = pl.cdiv(rows, tile_rows)
    ragged = (rows % tile_rows) != 0
    out_rows = 8 if tile_rows % 8 == 0 else 1   # tiny single-block case -> 1

    # ---- precomputed resident weight tiles (w[0]=interior, w[1]=tail-masked)
    pos = jnp.arange(tile_elems, dtype=jnp.int32)
    if fused:
        r = pos % period           # every block's base is a multiple of period
        w0 = (jnp.float32(sequence_weight * inv_seq)
              + jnp.where(r < D, jnp.float32(start_weight * inv_edge), 0.0)
              + jnp.where(r >= period - D, jnp.float32(end_weight * inv_edge), 0.0))
    else:
        w0 = jnp.full((tile_elems,), sequence_weight * inv_seq, jnp.float32)
    tail_valid = N - (nb - 1) * tile_elems      # valid elements in last block
    w1 = jnp.where(pos < tail_valid, w0, jnp.float32(0.0))
    w = jnp.stack([w0, w1]).reshape(2, tile_rows, lane).astype(jnp.float32)

    p2 = predictions.reshape(rows, lane)
    t2 = targets.reshape(rows, lane)

    # ---- kernel --------------------------------------------------------------
    def kernel(p_ref, t_ref, w_ref, o_ref):
        i = pl.program_id(0)

        @pl.when(i == 0)
        def _init():
            o_ref[...] = jnp.zeros(o_ref.shape, o_ref.dtype)

        p = p_ref[...].astype(jnp.float32)
        t = t_ref[...].astype(jnp.float32)
        diff = p - t
        sq = diff * diff
        wv = w_ref[0]

        def tile_partial(x):
            # (tile_rows, lane) -> (out_rows, lane); elementwise vreg adds
            # (VALU) when tile_rows % 8 == 0, no per-step XLU scalar reduce.
            if tile_rows % 8 == 0:
                return jnp.sum(x.reshape(tile_rows // 8, 8, lane), axis=0)
            return jnp.sum(x, axis=0, keepdims=True)

        if ragged:
            @pl.when(i < nb - 1)
            def _interior():
                o_ref[...] += tile_partial(sq * wv)

            @pl.when(i == nb - 1)
            def _tail():
                # The last block may read past the array; its weight copy
                # (w[1]) is zero there and the select keeps any NaN/Inf
                # garbage out of the accumulation.
                o_ref[...] += tile_partial(
                    jnp.where(wv == 0.0, jnp.float32(0.0), sq * wv))
        else:
            o_ref[...] += tile_partial(sq * wv)

    # ---- index maps ----------------------------------------------------------
    if ragged:
        def w_index(i):
            return ((i >= nb - 1).astype(jnp.int32), 0, 0)
    else:
        def w_index(i):
            return (0, 0, 0)

    out = pl.pallas_call(
        kernel,
        out_shape=jax.ShapeDtypeStruct((out_rows, lane), jnp.float32),
        grid=(nb,),
        in_specs=[
            pl.BlockSpec((tile_rows, lane), lambda i: (i, 0)),
            pl.BlockSpec((tile_rows, lane), lambda i: (i, 0)),
            pl.BlockSpec((1, tile_rows, lane), w_index),   # resident weight tile
        ],
        out_specs=pl.BlockSpec((out_rows, lane), lambda i: (0, 0)),
        compiler_params=pltpu.CompilerParams(
            dimension_semantics=("arbitrary",),
            vmem_limit_bytes=32 * 1024 * 1024,
        ),
        cost_estimate=pl.CostEstimate(
            flops=5 * N,
            transcendentals=0,
            bytes_accessed=2 * N * itemsize + 2 * tile_elems * 4
                           + out_rows * lane * 4,
        ),
    )(p2, t2, w)

    total = jnp.sum(out)

    if not fused:
        # Edge-slice MSEs touch only 2/T of the data; plain JAX is fine here.
        p0 = predictions[:, 0].astype(jnp.float32)
        t0 = targets[:, 0].astype(jnp.float32)
        pL = predictions[:, -1].astype(jnp.float32)
        tL = targets[:, -1].astype(jnp.float32)
        total = (total
                 + jnp.float32(start_weight) * jnp.mean((p0 - t0) ** 2)
                 + jnp.float32(end_weight) * jnp.mean((pL - tL) ** 2))

    return total


def _reference_loss(predictions, targets,
                    start_weight=1.0, end_weight=1.0, sequence_weight=1.0):
    """Pure-JAX reference for correctness checking."""
    seq = jnp.mean((predictions - targets) ** 2)
    start = jnp.mean((predictions[:, 0] - targets[:, 0]) ** 2)
    end = jnp.mean((predictions[:, -1] - targets[:, -1]) ** 2)
    return sequence_weight * seq + start_weight * start + end_weight * end


if __name__ == "__main__":
    start_weight, end_weight, sequence_weight = 0.7, 1.3, 0.9
    key = jax.random.PRNGKey(0)

    # (shape, max_tile_elems).  The first is the canonical LSTM-style
    # [batch, seq, features] output; the later tiny-tile cases force the
    # multi-block (ragged) and non-fused fallback code paths.
    cases = [
        ((2, 8, 32), _MAX_TILE_ELEMS),    # fused, single block, lane=128
        ((4, 16, 32), _MAX_TILE_ELEMS),   # fused, single block, (8,128) acc
        ((2, 1, 32), _MAX_TILE_ELEMS),    # T == 1 (start == end == sequence)
        ((10, 2, 128), 1024),             # fused, multi-block, ragged tail
        ((3, 17, 128), 1024),             # non-fused fallback, ragged tail
    ]

    for (B, T, D), mte in cases:
        key, kp, kt = jax.random.split(key, 3)
        predictions = jax.random.normal(kp, (B, T, D), dtype=jnp.float32)
        targets = jax.random.normal(kt, (B, T, D), dtype=jnp.float32)

        loss = custom_sequence_loss(predictions, targets,
                                    start_weight=start_weight,
                                    end_weight=end_weight,
                                    sequence_weight=sequence_weight,
                                    max_tile_elems=mte)
        loss = jax.block_until_ready(loss)

        ref = _reference_loss(predictions, targets,
                              start_weight=start_weight,
                              end_weight=end_weight,
                              sequence_weight=sequence_weight)
        assert jnp.allclose(loss, ref, rtol=1e-5, atol=1e-5), (
            (B, T, D), float(loss), float(ref))

    print("KERNEL_OK")
</pallas_src>

<mosaic_0001>
module attributes {stable_mosaic.version = 11 : i64} {
  func.func @kernel(%arg0: i32, %arg1: memref<4x128xf32, #tpu.memory_space<vmem>>, %arg2: memref<4x128xf32, #tpu.memory_space<vmem>>, %arg3: memref<1x4x128xf32, #tpu.memory_space<vmem>>, %arg4: memref<1x128xf32, #tpu.memory_space<vmem>>) attributes {dimension_semantics = [#tpu.dimension_semantics<arbitrary>], iteration_bounds = array<i64: 1>, scalar_prefetch = 0 : i64, scratch_operands = 0 : i64, tpu.core_type = #tpu.core_type<tc>, window_params = [{transform_indices = @transform_0, window_bounds = array<i64: 4, 128>}, {transform_indices = @transform_1, window_bounds = array<i64: 4, 128>}, {transform_indices = @transform_2, window_bounds = array<i64: 1, 4, 128>}, {pipeline_mode = #tpu.pipeline_mode<synchronous>, transform_indices = @transform_3, window_bounds = array<i64: 1, 128>}]} {
    %c0_i32 = arith.constant 0 : i32
    %0 = arith.cmpi eq, %arg0, %c0_i32 : i32
    %1 = arith.extui %0 : i1 to i32
    %c0_i32_0 = arith.constant 0 : i32
    %2 = arith.cmpi ne, %1, %c0_i32_0 : i32
    scf.if %2 {
      %cst_11 = arith.constant 0.000000e+00 : f32
      %15 = vector.broadcast %cst_11 : f32 to vector<1x128xf32>
      %c0_12 = arith.constant 0 : index
      %c0_13 = arith.constant 0 : index
      %16 = vector.load %arg4[%c0_12, %c0_13] : memref<1x128xf32, #tpu.memory_space<vmem>>, vector<1x128xf32>
      tpu.vector_store %arg4[%c0_12, %c0_13], %15 {strides = array<i32>} : memref<1x128xf32, #tpu.memory_space<vmem>>, vector<1x128xf32>,
    } else {
    }
    %c0 = arith.constant 0 : index
    %c0_1 = arith.constant 0 : index
    %3 = vector.load %arg1[%c0, %c0_1] : memref<4x128xf32, #tpu.memory_space<vmem>>, vector<4x128xf32>
    %c0_2 = arith.constant 0 : index
    %c0_3 = arith.constant 0 : index
    %4 = vector.load %arg2[%c0_2, %c0_3] : memref<4x128xf32, #tpu.memory_space<vmem>>, vector<4x128xf32>
    %5 = arith.subf %3, %4 : vector<4x128xf32>
    %6 = arith.mulf %5, %5 : vector<4x128xf32>
    %c0_4 = arith.constant 0 : index
    %c0_5 = arith.constant 0 : index
    %c0_6 = arith.constant 0 : index
    %7 = vector.load %arg3[%c0_4, %c0_5, %c0_6] : memref<1x4x128xf32, #tpu.memory_space<vmem>>, vector<1x4x128xf32>
    %8 = vector.shape_cast %7 : vector<1x4x128xf32> to vector<4x128xf32>
    %c0_7 = arith.constant 0 : index
    %c0_8 = arith.constant 0 : index
    %9 = vector.load %arg4[%c0_7, %c0_8] : memref<1x128xf32, #tpu.memory_space<vmem>>, vector<1x128xf32>
    %10 = arith.mulf %6, %8 : vector<4x128xf32>
    %cst = arith.constant dense<0.000000e+00> : vector<128xf32>
    %11 = vector.multi_reduction <add>, %10, %cst [0] : vector<4x128xf32> to vector<128xf32>
    %12 = vector.shape_cast %11 : vector<128xf32> to vector<1x128xf32>
    %13 = arith.addf %9, %12 : vector<1x128xf32>
    %c0_9 = arith.constant 0 : index
    %c0_10 = arith.constant 0 : index
    %14 = vector.load %arg4[%c0_9, %c0_10] : memref<1x128xf32, #tpu.memory_space<vmem>>, vector<1x128xf32>
    tpu.vector_store %arg4[%c0_9, %c0_10], %13 {strides = array<i32>} : memref<1x128xf32, #tpu.memory_space<vmem>>, vector<1x128xf32>,
    return
  }
  func.func @transform_0(%arg0: i32) -> (i32, i32) {
    %c0_i32 = arith.constant 0 : i32
    %c0_i32_0 = arith.constant 0 : i32
    return %arg0, %c0_i32 : i32, i32
  }
  func.func @transform_1(%arg0: i32) -> (i32, i32) {
    %c0_i32 = arith.constant 0 : i32
    %c0_i32_0 = arith.constant 0 : i32
    return %arg0, %c0_i32 : i32, i32
  }
  func.func @transform_2(%arg0: i32) -> (i32, i32, i32) {
    %c0_i32 = arith.constant 0 : i32
    %c0_i32_0 = arith.constant 0 : i32
    %c0_i32_1 = arith.constant 0 : i32
    %c0_i32_2 = arith.constant 0 : i32
    return %c0_i32, %c0_i32_0, %c0_i32_1 : i32, i32, i32
  }
  func.func @transform_3(%arg0: i32) -> (i32, i32) {
    %c0_i32 = arith.constant 0 : i32
    %c0_i32_0 = arith.constant 0 : i32
    %c0_i32_1 = arith.constant 0 : i32
    return %c0_i32, %c0_i32_0 : i32, i32
  }
}

</mosaic_0001>

<bundles_post_ra>
// kernel: tpu_custom_call.1
= control target key start
LH: loop header
LB: loop body
LE: loop exit
PB: predicated region body
PF: predicated region fallthrough
CT: control target
= control target key end

     0   :  { %8 = vsyncpa [#allocation3], 0  ;;  %s263_s0 = inlined_call_operand.hbm [shape: f32[4,128], index: 0, kind: input, shape index: {}]   ;;  %s264_s1 = inlined_call_operand.hbm [shape: f32[4,128], index: 1, kind: input, shape index: {}]   ;;  %s265_s2 = inlined_call_operand.hbm [shape: f32[2,4,128], index: 2, kind: input, shape index: {}]   ;;  %s266_s3 = inlined_call_operand.hbm [shape: f32[1,128], index: 3, kind: output, shape index: {}]  }
   0x1   :  { %9 = vsyncpa [#allocation6], 0 }
   0x2   :  { %10 = vsyncpa [#allocation4], 0  ;;  %s187_s12 = smov [#allocation5]   ;;  %s188_s14 = smov [#allocation2]  }
   0x3   :  { %s27_s13 = sshll.u32 %s187_s12, 4  ;;  %s17_s15 = sshll.u32 %s188_s14, 4  ;;  %s28_s13 = int_to_ptr.vmem [resolvable:$true] %s27_s13  ;;  %s18_s15 = int_to_ptr.vmem [resolvable:$true] %s17_s15 }
   0x4   :  { %s93_s18 = scalar_lea.hbm %s264_s1, 64 }
   0x5   :  { %p94_p0 = scmp.ne.s32.totalorder %s264_s1, %s93_s18  ;;  %p97_p1 = scmp.lt.u32.totalorder %s93_s18, %s264_s1 }
   0x7   :  { %p99_p2 = pnand %p97_p1, %p94_p0 }
   0x9   :  { %102 = shalt.err (!%p99_p2)
}
   0xa   :  { %s103_s23 = scalar_lea.vmem %s28_s13, 64  ;;  %p108_p4 = scmp.lt.s32.totalorder %s28_s13, %s28_s13 }
   0xb   :  { %p104_p3 = scmp.ne.s32.totalorder %s28_s13, %s103_s23  ;;  %p109_p5 = scmp.lt.s32.totalorder %s103_s23, %s103_s23 }
   0xd   :  { %p110_p6 = por %p109_p5, %p108_p4 }
   0xf   :  { %p111_p7 = pnand %p110_p6, %p104_p3 }
  0x11   :  { %114 = shalt.err (!%p111_p7)
}
  0x12   :  { %30 = dma.hbm_to_vmem [thread:$0]  %s264_s1, 64, %s28_s13, [#allocation6]  }
  0x13   :  { %s115_s28 = scalar_lea.hbm %s263_s0, 64 }
  0x14   :  { %p116_p8 = scmp.ne.s32.totalorder %s263_s0, %s115_s28  ;;  %p119_p9 = scmp.lt.u32.totalorder %s115_s28, %s263_s0 }
  0x16   :  { %p121_p10 = pnand %p119_p9, %p116_p8 }
  0x18   :  { %124 = shalt.err (!%p121_p10)
}
  0x19   :  { %s125_s6 = scalar_lea.vmem %s18_s15, 64  ;;  %p130_p12 = scmp.lt.s32.totalorder %s18_s15, %s18_s15 }
  0x1a   :  { %p126_p11 = scmp.ne.s32.totalorder %s18_s15, %s125_s6  ;;  %p131_p13 = scmp.lt.s32.totalorder %s125_s6, %s125_s6 }
  0x1c   :  { %p132_p0 = por %p131_p13, %p130_p12 }
  0x1e   :  { %p133_p1 = pnand %p132_p0, %p126_p11 }
  0x20   :  { %136 = shalt.err (!%p133_p1)
}
  0x21   :  { %20 = dma.hbm_to_vmem [thread:$0]  %s263_s0, 64, %s18_s15, [#allocation3]  }
  0x22   :  { %s189_s8 = smov [#allocation7]   ;;  %s137_s12 = scalar_lea.hbm %s265_s2, 64 }
  0x23   :  { %s37_s9 = sshll.u32 %s189_s8, 4  ;;  %p138_p2 = scmp.ne.s32.totalorder %s265_s2, %s137_s12  ;;  %s38_s9 = int_to_ptr.vmem [resolvable:$true] %s37_s9 }
  0x24   :  { %s139_s18 = scalar_lea.hbm %s265_s2, 128  ;;  %p141_p4 = scmp.lt.u32.totalorder %s137_s12, %s265_s2 }
  0x25   :  { %p140_p3 = scmp.lt.u32.totalorder %s139_s18, %s137_s12 }
  0x27   :  { %p142_p5 = por %p141_p4, %p140_p3 }
  0x29   :  { %p143_p6 = pnand %p142_p5, %p138_p2 }
  0x2b   :  { %146 = shalt.err (!%p143_p6)
}
  0x2c   :  { %s147_s0 = scalar_lea.vmem %s38_s9, 64  ;;  %p152_p8 = scmp.lt.s32.totalorder %s38_s9, %s38_s9 }
  0x2d   :  { %p148_p7 = scmp.ne.s32.totalorder %s38_s9, %s147_s0  ;;  %p153_p9 = scmp.lt.s32.totalorder %s147_s0, %s147_s0 }
  0x2f   :  { %p154_p10 = por %p153_p9, %p152_p8 }
  0x31   :  { %p155_p11 = pnand %p154_p10, %p148_p7 }
  0x33   :  { %158 = shalt.err (!%p155_p11)
}
  0x34   :  { %40 = dma.hbm_to_vmem [thread:$0]  %s265_s2, 64, %s38_s9, [#allocation6]  }
  0x35   :  { %181 = dma.done.wait [#allocation3], 64  }
  0x36   :  { %182 = vsyncadd [#allocation3], 4294967232 }
  0x37   :  { %183 = dma.done.wait [#allocation6], 128  }
  0x38   :  { %184 = vsyncadd [#allocation6], 4294967168  ;;  %v190_v0 = vmov 0.0   ;;  %v55_v1 = vld [vmem:[#allocation2] sm:$0xf]  ;;  %vm62_vm0 = vcmask 1043456  }
  0x39   :  { %54 = vst [vmem:[#allocation8] sm:$0x1] %v190_v0  ;;  %v56_v2 = vld [vmem:[#allocation5] sm:$0xf]  ;;  %v59_v4 = vld [vmem:[#allocation7] sm:$0xf] }
  0x3a   :  { %v57_v3 = vsub.f32 %v55_v1, %v56_v2  ;;  %s191_s2 = smov [#allocation8]  }
  0x3b   :  { %s78_s22 = sshll.u32 %s191_s2, 4  ;;  %s79_s22 = int_to_ptr.vmem [resolvable:$true] %s78_s22 }
  0x3c   :  { %v58_v5 = vmul.f32 %v57_v3, %v57_v3  ;;  %s159_s23 = scalar_lea.vmem %s79_s22, 16  ;;  %s163_s24 = scalar_lea.vmem %s79_s22, 32 }
  0x3d   :  { %p160_p12 = scmp.ne.s32.totalorder %s79_s22, %s159_s23  ;;  %p164_p13 = scmp.lt.s32.totalorder %s79_s22, %s79_s22 }
  0x3e   :  { %v61_v6 = vmul.f32 %v59_v4, %v58_v5  ;;  %p165_p0 = scmp.lt.s32.totalorder %s163_s24, %s159_s23 }
  0x40   :  { %v63_v7 = vsel %vm62_vm0, %v61_v6, 0.0  ;;  %v60_v13 = vld [vmem:[#allocation8] sm:$0x1]  ;;  %p166_p1 = por %p165_p0, %p164_p13 }
  0x41   :  { %v64_v8 = vrot.slane %v63_v7, 4 }
  0x42   :  { %p167_p2 = pnand %p166_p1, %p160_p12 }
  0x43   :  { %v65_v9 = vadd.f32 %v64_v8, %v63_v7 }
  0x45   :  { %v66_v10 = vrot.slane %v65_v9, 2 }
  0x47   :  { %v67_v11 = vadd.f32 %v66_v10, %v65_v9 }
  0x49   :  { %v68_v12 = vrot.slane %v67_v11, 1 }
  0x4b   :  { %v69_v14 = vadd.f32 %v68_v12, %v67_v11 }
  0x4d   :  { %v70_v15 = vadd.f32 %v69_v14, %v60_v13 }
  0x4f   :  { %71 = vst [vmem:[#allocation8] sm:$0x1] %v70_v15 }
  0x50   :  { %170 = shalt.err (!%p167_p2)
}
  0x51   :  { %s171_s27 = scalar_lea.hbm %s266_s3, 16 }
  0x52   :  { %p172_p3 = scmp.ne.s32.totalorder %s266_s3, %s171_s27  ;;  %p175_p4 = scmp.lt.u32.totalorder %s171_s27, %s266_s3 }
  0x54   :  { %p177_p5 = pnand %p175_p4, %p172_p3 }
  0x56   :  { %180 = shalt.err (!%p177_p5)
}
  0x57   :  { %81 = dma.vmem_to_hbm [thread:$0]  %s79_s22, 16, %s266_s3, [#allocation4]  }
  0x58   :  { %185 = dma.done.wait [#allocation4], 16  }
  0x59   :  { %186 = vsyncadd [#allocation4], 4294967280 }
  0x5a   :  { %85 = vsyncpa [#allocation3], 1 }
  0x5b   :  { %86 = vsyncpa [#allocation6], 1 }
  0x5c   :  { %87 = vsyncpa [#allocation4], 1 }

</bundles_post_ra>
